<compile_context>
chip_gen: v7x
topology: tpu7x:2x2x1
jax: 0.10.0
libtpu: 0.0.40
codegen_flags: <defaults>
</compile_context>

<pallas_src>
import jax
import jax.numpy as jnp
from jax.experimental import pallas as pl
from jax.experimental.pallas import tpu as pltpu


def _round_up(x: int, m: int) -> int:
    return ((x + m - 1) // m) * m


def _cdiv(a: int, b: int) -> int:
    return -(-a // b)


def _vmem_capacity_bytes() -> int:
    """Physical VMEM of the current chip; conservative fallback if unavailable."""
    try:
        return int(pltpu.get_tpu_info().vmem_capacity_bytes)
    except Exception:
        return 64 << 20  # v7x per-TensorCore VMEM (smallest of v5e/v6e/v7x)


def decoder_kernel(x_ref, w1_ref, b1_ref, w2_ref, b2_ref, out_ref):
    """One batch tile of the fused forward pass.

    x_ref  : (TB, D_in)   f32   (cast to bf16 in-kernel; VPU cast hides under MXU/DMA)
    w1_ref : (D_in, H)    bf16  (VMEM-resident across batch tiles)
    b1_ref : (1, H)       f32
    w2_ref : (H, D_out)   bf16  (VMEM-resident across batch tiles)
    b2_ref : (1, D_out)   f32
    out_ref: (TB, D_out)  out_dtype
    """
    x = x_ref[...].astype(jnp.bfloat16)
    # Layer 1: bf16 MXU matmul, f32 accumulate; bias + tanh in f32 (v5e-safe).
    h = jnp.dot(x, w1_ref[...], preferred_element_type=jnp.float32)
    h = jnp.tanh(h + b1_ref[...])
    # Layer 2: cast the activation back to bf16 for the MXU, accumulate f32.
    y = jnp.dot(h.astype(jnp.bfloat16), w2_ref[...],
                preferred_element_type=jnp.float32)
    out_ref[...] = jax.nn.sigmoid(y + b2_ref[...]).astype(out_ref.dtype)


def prepare_decoder_params(w1, b1, w2, b2):
    """One-time parameter prep (bf16 weights, f32 row biases).

    Call once and cache the result; this keeps the per-call path free of the
    weight cast/re-write HBM round trip.
    """
    return (w1.astype(jnp.bfloat16),
            jnp.asarray(b1, jnp.float32).reshape(1, -1),
            w2.astype(jnp.bfloat16),
            jnp.asarray(b2, jnp.float32).reshape(1, -1))


def decoder_forward(x, w1, b1, w2, b2, *, out_dtype=jnp.float32):
    """x: (B, D_in) f32. Params as (in, out) weights + (1, F) biases.

    Returns (B, D_out) out_dtype, matching sigmoid(tanh(x @ w1 + b1) @ w2 + b2)
    up to bf16 matmul-input precision.
    """
    B, D_in = x.shape
    H = w1.shape[1]
    D_out = w2.shape[1]

    # Accept either prepared (bf16) or raw f32 params; astype is a no-op if
    # already prepared (use prepare_decoder_params once to hoist the cast).
    w1 = w1.astype(jnp.bfloat16)
    w2 = w2.astype(jnp.bfloat16)
    b1 = jnp.asarray(b1, jnp.float32).reshape(1, H)
    b2 = jnp.asarray(b2, jnp.float32).reshape(1, D_out)

    out_bytes = jnp.dtype(out_dtype).itemsize

    # ---- VMEM budget from the actual chip -----------------------------------
    vmem_cap = _vmem_capacity_bytes()
    budget = max(vmem_cap - (8 << 20), 16 << 20)

    # Resident (constant index_map) operands: the default pipeline
    # double-buffers even revisited inputs, so count them twice.
    # TODO(synk): if 2x-bf16 weights ever exceed `budget` (very large H/D_out),
    # add an extra "arbitrary" grid axis tiling H/D_out with a VMEM accumulator
    # instead of shrinking TB toward nothing.
    resident = 2 * 2 * (w1.size + w2.size) + 2 * 4 * (b1.size + b2.size)

    # Per batch-row VMEM: double-buffered f32 x tile + out tile, plus the
    # f32 + bf16 hidden activation.
    per_row = 2 * 4 * D_in + 2 * out_bytes * D_out + 6 * H
    tb_max = (budget - resident) // max(per_row, 1)
    tb_max = max(8, min((int(tb_max) // 8) * 8, 2048))

    # ---- batch tiling: spread padding evenly, keep >=2 tiles when possible ---
    # (>=2 tiles lets the "parallel" batch axis split across both v7x TCs.)
    min_tiles = 2 if B >= 16 else 1
    num_tiles = max(_cdiv(B, tb_max), min_tiles)
    TB = _round_up(_cdiv(B, num_tiles), 8)
    B_p = TB * num_tiles

    x_p = x.astype(jnp.float32)
    if B_p != B:
        x_p = jnp.pad(x_p, ((0, B_p - B), (0, 0)))  # zero rows: exact, sliced off below

    need = resident + TB * per_row + (4 << 20)
    vmem_limit = int(min(max(need, 32 << 20), max(vmem_cap - (4 << 20), 32 << 20)))

    cost = pl.CostEstimate(
        flops=2 * B_p * (D_in * H + H * D_out),
        transcendentals=B_p * (H + D_out),
        bytes_accessed=(B_p * D_in * 4 + w1.size * 2 + w2.size * 2
                        + b1.size * 4 + b2.size * 4 + B_p * D_out * out_bytes),
    )

    out_p = pl.pallas_call(
        decoder_kernel,
        out_shape=jax.ShapeDtypeStruct((B_p, D_out), out_dtype),
        grid_spec=pl.GridSpec(
            grid=(num_tiles,),
            in_specs=[
                pl.BlockSpec((TB, D_in), lambda i: (i, 0)),    # x tile (f32, unpadded feats)
                pl.BlockSpec((D_in, H), lambda i: (0, 0)),     # w1 resident
                pl.BlockSpec((1, H), lambda i: (0, 0)),        # b1 resident
                pl.BlockSpec((H, D_out), lambda i: (0, 0)),    # w2 resident
                pl.BlockSpec((1, D_out), lambda i: (0, 0)),    # b2 resident
            ],
            out_specs=pl.BlockSpec((TB, D_out), lambda i: (i, 0)),
        ),
        compiler_params=pltpu.CompilerParams(
            dimension_semantics=("parallel",),   # v7x: shard batch tiles on 2 TCs
            vmem_limit_bytes=vmem_limit,
        ),
        cost_estimate=cost,
    )(x_p, w1, b1, w2, b2)

    # Only batch padding needs slicing off; feature dims were never padded.
    return out_p[:B] if B_p != B else out_p


def init_decoder_params(key, input_dim, hidden_dim, output_dim):
    """Deterministic init mirroring nn.Linear's U(-1/sqrt(fan_in), 1/sqrt(fan_in)).

    Weights stored transposed relative to PyTorch, i.e. (in, out), so the
    kernel computes x @ W (== x @ W_pt.T). Biases are (1, F) rows.
    """
    k1, k2, k3, k4 = jax.random.split(key, 4)
    bound1 = 1.0 / jnp.sqrt(input_dim)
    bound2 = 1.0 / jnp.sqrt(hidden_dim)
    w1 = jax.random.uniform(k1, (input_dim, hidden_dim), jnp.float32, -bound1, bound1)
    b1 = jax.random.uniform(k2, (1, hidden_dim), jnp.float32, -bound1, bound1)
    w2 = jax.random.uniform(k3, (hidden_dim, output_dim), jnp.float32, -bound2, bound2)
    b2 = jax.random.uniform(k4, (1, output_dim), jnp.float32, -bound2, bound2)
    return w1, b1, w2, b2


if __name__ == "__main__":
    # Small shapes consistent with Decoder(input_dim, hidden_dim, output_dim).
    batch, input_dim, hidden_dim, output_dim = 8, 32, 64, 128

    key = jax.random.PRNGKey(0)
    k_x, k_p = jax.random.split(key)
    x = jax.random.normal(k_x, (batch, input_dim), jnp.float32)
    w1, b1, w2, b2 = init_decoder_params(k_p, input_dim, hidden_dim, output_dim)

    # One-time weight prep (bf16 cast) hoisted out of the per-call path.
    params = prepare_decoder_params(w1, b1, w2, b2)

    fwd = jax.jit(decoder_forward)
    out = jax.block_until_ready(fwd(x, *params))

    # Pure-JAX f32 reference (same math as the PyTorch module). bf16 matmul
    # inputs with f32 accumulation -> relaxed tolerance.
    ref = jax.nn.sigmoid(jnp.tanh(x @ w1 + b1) @ w2 + b2)
    assert out.shape == (batch, output_dim)
    max_err = float(jnp.max(jnp.abs(out - ref)))
    assert jnp.allclose(out, ref, atol=2e-2, rtol=2e-2), max_err

    print("KERNEL_OK")
</pallas_src>

<mosaic_0001>
module attributes {stable_mosaic.version = 11 : i64} {
  func.func @decoder_kernel(%arg0: i32, %arg1: memref<8x32xf32, #tpu.memory_space<vmem>>, %arg2: memref<32x64xbf16, #tpu.memory_space<vmem>>, %arg3: memref<1x64xf32, #tpu.memory_space<vmem>>, %arg4: memref<64x128xbf16, #tpu.memory_space<vmem>>, %arg5: memref<1x128xf32, #tpu.memory_space<vmem>>, %arg6: memref<8x128xf32, #tpu.memory_space<vmem>>) attributes {dimension_semantics = [#tpu.dimension_semantics<parallel>], iteration_bounds = array<i64: 1>, scalar_prefetch = 0 : i64, scratch_operands = 0 : i64, tpu.core_type = #tpu.core_type<tc>, window_params = [{transform_indices = @transform_0, window_bounds = array<i64: 8, 32>}, {pipeline_mode = #tpu.pipeline_mode<synchronous>, transform_indices = @transform_1, window_bounds = array<i64: 32, 64>}, {pipeline_mode = #tpu.pipeline_mode<synchronous>, transform_indices = @transform_2, window_bounds = array<i64: 1, 64>}, {pipeline_mode = #tpu.pipeline_mode<synchronous>, transform_indices = @transform_3, window_bounds = array<i64: 64, 128>}, {pipeline_mode = #tpu.pipeline_mode<synchronous>, transform_indices = @transform_4, window_bounds = array<i64: 1, 128>}, {transform_indices = @transform_5, window_bounds = array<i64: 8, 128>}]} {
    %c0 = arith.constant 0 : index
    %c0_0 = arith.constant 0 : index
    %0 = vector.load %arg1[%c0, %c0_0] : memref<8x32xf32, #tpu.memory_space<vmem>>, vector<8x32xf32>
    %1 = arith.truncf %0 : vector<8x32xf32> to vector<8x32xbf16>
    %c0_1 = arith.constant 0 : index
    %c0_2 = arith.constant 0 : index
    %2 = vector.load %arg2[%c0_1, %c0_2] : memref<32x64xbf16, #tpu.memory_space<vmem>>, vector<32x64xbf16>
    %cst = arith.constant dense<0.000000e+00> : vector<8x64xf32>
    %3 = tpu.matmul %1, %2, %cst {dimension_numbers = #tpu.dot_dimension_numbers<[1], [0], [0], [1], [0, 0, 1, 1], [], []>} : vector<8x32xbf16>, vector<32x64xbf16>, vector<8x64xf32> -> vector<8x64xf32>
    %c0_3 = arith.constant 0 : index
    %c0_4 = arith.constant 0 : index
    %4 = vector.load %arg3[%c0_3, %c0_4] : memref<1x64xf32, #tpu.memory_space<vmem>>, vector<1x64xf32>
    %5 = vector.broadcast %4 : vector<1x64xf32> to vector<8x64xf32>
    %6 = arith.addf %3, %5 : vector<8x64xf32>
    %7 = math.tanh %6 : vector<8x64xf32>
    %8 = arith.truncf %7 : vector<8x64xf32> to vector<8x64xbf16>
    %c0_5 = arith.constant 0 : index
    %c0_6 = arith.constant 0 : index
    %9 = vector.load %arg4[%c0_5, %c0_6] : memref<64x128xbf16, #tpu.memory_space<vmem>>, vector<64x128xbf16>
    %cst_7 = arith.constant dense<0.000000e+00> : vector<8x128xf32>
    %10 = tpu.matmul %8, %9, %cst_7 {dimension_numbers = #tpu.dot_dimension_numbers<[1], [0], [0], [1], [0, 0, 1, 1], [], []>} : vector<8x64xbf16>, vector<64x128xbf16>, vector<8x128xf32> -> vector<8x128xf32>
    %c0_8 = arith.constant 0 : index
    %c0_9 = arith.constant 0 : index
    %11 = vector.load %arg5[%c0_8, %c0_9] : memref<1x128xf32, #tpu.memory_space<vmem>>, vector<1x128xf32>
    %12 = vector.broadcast %11 : vector<1x128xf32> to vector<8x128xf32>
    %13 = arith.addf %10, %12 : vector<8x128xf32>
    %14 = arith.negf %13 : vector<8x128xf32>
    %15 = math.exp %14 : vector<8x128xf32>
    %cst_10 = arith.constant 1.000000e+00 : f32
    %16 = vector.broadcast %cst_10 : f32 to vector<8x128xf32>
    %17 = arith.addf %16, %15 : vector<8x128xf32>
    %18 = arith.divf %16, %17 : vector<8x128xf32>
    %c0_11 = arith.constant 0 : index
    %c0_12 = arith.constant 0 : index
    %19 = vector.load %arg6[%c0_11, %c0_12] : memref<8x128xf32, #tpu.memory_space<vmem>>, vector<8x128xf32>
    tpu.vector_store %arg6[%c0_11, %c0_12], %18 {strides = array<i32>} : memref<8x128xf32, #tpu.memory_space<vmem>>, vector<8x128xf32>,
    return
  }
  func.func @transform_0(%arg0: i32) -> (i32, i32) {
    %c0_i32 = arith.constant 0 : i32
    %c0_i32_0 = arith.constant 0 : i32
    return %arg0, %c0_i32 : i32, i32
  }
  func.func @transform_1(%arg0: i32) -> (i32, i32) {
    %c0_i32 = arith.constant 0 : i32
    %c0_i32_0 = arith.constant 0 : i32
    %c0_i32_1 = arith.constant 0 : i32
    return %c0_i32, %c0_i32_0 : i32, i32
  }
  func.func @transform_2(%arg0: i32) -> (i32, i32) {
    %c0_i32 = arith.constant 0 : i32
    %c0_i32_0 = arith.constant 0 : i32
    %c0_i32_1 = arith.constant 0 : i32
    return %c0_i32, %c0_i32_0 : i32, i32
  }
  func.func @transform_3(%arg0: i32) -> (i32, i32) {
    %c0_i32 = arith.constant 0 : i32
    %c0_i32_0 = arith.constant 0 : i32
    %c0_i32_1 = arith.constant 0 : i32
    return %c0_i32, %c0_i32_0 : i32, i32
  }
  func.func @transform_4(%arg0: i32) -> (i32, i32) {
    %c0_i32 = arith.constant 0 : i32
    %c0_i32_0 = arith.constant 0 : i32
    %c0_i32_1 = arith.constant 0 : i32
    return %c0_i32, %c0_i32_0 : i32, i32
  }
  func.func @transform_5(%arg0: i32) -> (i32, i32) {
    %c0_i32 = arith.constant 0 : i32
    %c0_i32_0 = arith.constant 0 : i32
    return %arg0, %c0_i32 : i32, i32
  }
}

</mosaic_0001>

<bundles_post_ra>
// kernel: decoder_forward.1
= control target key start
LH: loop header
LB: loop body
LE: loop exit
PB: predicated region body
PF: predicated region fallthrough
CT: control target
= control target key end

     0   :  { %10 = vsyncpa [#allocation3], 0  ;;  %s489_s0 = inlined_call_operand.hbm [shape: f32[8,32], index: 0, kind: input, shape index: {}]   ;;  %s490_s1 = inlined_call_operand.hbm [shape: bf16[32,64], index: 1, kind: input, shape index: {}]   ;;  %s491_s2 = inlined_call_operand.vmem [shape: f32[1,64], index: 2, kind: input, shape index: {}]   ;;  %s492_s3 = inlined_call_operand.hbm [shape: bf16[64,128], index: 3, kind: input, shape index: {}]   ;;  %s493_s4 = inlined_call_operand.vmem [shape: f32[1,128], index: 4, kind: input, shape index: {}]   ;;  %s494_s5 = inlined_call_operand.hbm [shape: f32[8,128], index: 5, kind: output, shape index: {}]  }
   0x1   :  { %11 = vsyncpa [#allocation6], 0 }
   0x2   :  { %12 = vsyncpa [#allocation4], 0  ;;  %s391_s18 = smov [#allocation5]   ;;  %s297_s22 = scalar_lea.hbm %s490_s1, 256 }
   0x3   :  { %s28_s19 = sshll.u32 %s391_s18, 4  ;;  %p298_p0 = scmp.ne.s32.totalorder %s490_s1, %s297_s22  ;;  %s29_s19 = int_to_ptr.vmem [resolvable:$true] %s28_s19 }
   0x4   :  { %p301_p1 = scmp.lt.u32.totalorder %s297_s22, %s490_s1 }
   0x6   :  { %p303_p2 = pnand %p301_p1, %p298_p0 }
   0x8   :  { %306 = shalt.err (!%p303_p2)
}
   0x9   :  { %s307_s27 = scalar_lea.vmem %s29_s19, 256  ;;  %p312_p4 = scmp.lt.s32.totalorder %s29_s19, %s29_s19 }
   0xa   :  { %p308_p3 = scmp.ne.s32.totalorder %s29_s19, %s307_s27  ;;  %p313_p5 = scmp.lt.s32.totalorder %s307_s27, %s307_s27 }
   0xc   :  { %p314_p6 = por %p313_p5, %p312_p4 }
   0xe   :  { %p315_p7 = pnand %p314_p6, %p308_p3 }
  0x10   :  { %318 = shalt.err (!%p315_p7)
}
  0x11   :  { %s392_s28 = smov 64   ;;  %s393_s29 = smov 4  }
  0x12   :  { %34 = dma.hbm_to_vmem [thread:$0]  %s490_s1, 256, %s29_s19, [#allocation6], %s392_s28, %s392_s28, %s393_s29  }
  0x13   :  { %s394_s7 = smov [#allocation2]   ;;  %s395_s9 = smov [#allocation7]  }
  0x14   :  { %s19_s8 = sshll.u32 %s394_s7, 4  ;;  %s42_s10 = sshll.u32 %s395_s9, 4  ;;  %s20_s8 = int_to_ptr.vmem [resolvable:$true] %s19_s8  ;;  %s43_s10 = int_to_ptr.vmem [resolvable:$true] %s42_s10 }
  0x15   :  { %s319_s13 = scalar_lea.hbm %s489_s0, 128 }
  0x16   :  { %p320_p8 = scmp.ne.s32.totalorder %s489_s0, %s319_s13  ;;  %p323_p9 = scmp.lt.u32.totalorder %s319_s13, %s489_s0 }
  0x18   :  { %p325_p10 = pnand %p323_p9, %p320_p8 }
  0x1a   :  { %328 = shalt.err (!%p325_p10)
}
  0x1b   :  { %s329_s1 = scalar_lea.vmem %s20_s8, 128  ;;  %p334_p12 = scmp.lt.s32.totalorder %s20_s8, %s20_s8 }
  0x1c   :  { %p330_p11 = scmp.ne.s32.totalorder %s20_s8, %s329_s1  ;;  %p335_p13 = scmp.lt.s32.totalorder %s329_s1, %s329_s1 }
  0x1e   :  { %p336_p0 = por %p335_p13, %p334_p12 }
  0x20   :  { %p337_p1 = pnand %p336_p0, %p330_p11 }
  0x22   :  { %340 = shalt.err (!%p337_p1)
}
  0x23   :  { %22 = dma.hbm_to_vmem [thread:$0]  %s489_s0, 128, %s20_s8, [#allocation3]  }
  0x24   :  { %s341_s22 = scalar_lea.hbm %s492_s3, 512 }
  0x25   :  { %p342_p2 = scmp.ne.s32.totalorder %s492_s3, %s341_s22  ;;  %p345_p3 = scmp.lt.u32.totalorder %s341_s22, %s492_s3 }
  0x27   :  { %p347_p4 = pnand %p345_p3, %p342_p2 }
  0x29   :  { %350 = shalt.err (!%p347_p4)
}
  0x2a   :  { %s351_s27 = scalar_lea.vmem %s43_s10, 512  ;;  %p356_p6 = scmp.lt.s32.totalorder %s43_s10, %s43_s10 }
  0x2b   :  { %p352_p5 = scmp.ne.s32.totalorder %s43_s10, %s351_s27  ;;  %p357_p7 = scmp.lt.s32.totalorder %s351_s27, %s351_s27 }
  0x2d   :  { %p358_p8 = por %p357_p7, %p356_p6 }
  0x2f   :  { %p359_p9 = pnand %p358_p8, %p352_p5 }
  0x31   :  { %362 = shalt.err (!%p359_p9)
}
  0x32   :  { %48 = dma.hbm_to_vmem [thread:$0]  %s492_s3, 512, %s43_s10, [#allocation6], %s392_s28, %s392_s28, %s393_s29  }
  0x33   :  { %385 = dma.done.wait [#allocation3], 128  }
  0x34   :  { %386 = vsyncadd [#allocation3], 4294967168 }
  0x35   :  { %387 = dma.done.wait [#allocation6], 768  }
  0x36   :  { %388 = vsyncadd [#allocation6], 4294966528  ;;  %v396_v0 = vmov 0.0   ;;  %vm397_vm0 = vmmov 0   ;;  %v285_v1 = vld [vmem:[#allocation5] sm:$0xff]   ;;  %v286_v2 = vld [vmem:[#allocation5 + $0x8] sm:$0xff]  }
  0x37   :  { %257 = vmatprep.subr.bf16.mxu0 %v396_v0  ;;  %261 = vmatprep.mubr.msk.bf16.mxu0 %vm397_vm0, %v396_v0  ;;  %v61_v3 = vld [vmem:[#allocation2] sm:$0xff]  ;;  %vm86_vm1 = vcmask 261120   ;;  %v287_v5 = vld [vmem:[#allocation7] sm:$0xff]   ;;  %v289_v7 = vld [vmem:[#allocation7 + $0x10] sm:$0xff]   ;;  %vm171_vm2 = vcmask 523264  }
  0x38   :  { %265 = vmatprep.subr.bf16.mxu1 %v396_v0  ;;  %273 = vmatprep.mubr.msk.bf16.mxu1 %vm397_vm0, %v396_v0  ;;  %v62_v4 = vpack.c.bf16 %v61_v3, %v61_v3  ;;  %v288_v6 = vld [vmem:[#allocation7 + $0x8] sm:$0xff]   ;;  %v290_v8 = vld [vmem:[#allocation7 + $0x18] sm:$0xff]  }
  0x39   :  { %258 = vmatpush3.bf16.msra.mxu0 %v285_v1  ;;  %266 = vmatpush3.bf16.msra.mxu1 %v287_v5  ;;  %v238_v9 = vld [vmem:[%s491_s2] ss:$0 sm:$0xff]  ;;  %s398_s2 = smov [#allocation8]  }
  0x3a   :  { %259 = vmatprep.subr.bf16.mxu0 %v396_v0  ;;  %267 = vmatprep.subr.bf16.mxu1 %v396_v0  ;;  %v242_v17 = vld [vmem:[%s493_s4] ss:$0 sm:$0xff]  ;;  %s228_s7 = sshll.u32 %s398_s2, 4  ;;  %s229_s7 = int_to_ptr.vmem [resolvable:$true] %s228_s7 }
  0x3b   :  { %s363_s8 = scalar_lea.vmem %s229_s7, 128  ;;  %p368_p11 = scmp.lt.s32.totalorder %s229_s7, %s229_s7 }
  0x3c   :  { %p364_p10 = scmp.ne.s32.totalorder %s229_s7, %s363_s8  ;;  %p369_p12 = scmp.lt.s32.totalorder %s363_s8, %s363_s8 }
  0x3d   :  { %260 = vmatpush3.bf16.msra.mxu0 %v286_v2  ;;  %268 = vmatpush3.bf16.msra.mxu1 %v288_v6 }
  0x3e   :  { %269 = vmatprep.subr.bf16.mxu1 %v396_v0  ;;  %p370_p13 = por %p369_p12, %p368_p11 }
  0x40   :  { %262 = vmatmul.mubr.msk.bf16.vlgmr.msra.gmra.mrb[0].mxu0 %vm86_vm1, %v62_v4  ;;  %p371_p0 = pnand %p370_p13, %p364_p10 }
  0x41   :  { %270 = vmatpush3.bf16.msra.mxu1 %v289_v7 }
  0x42   :  { %271 = vmatprep.subr.bf16.mxu1 %v396_v0 }
  0x45   :  { %272 = vmatpush3.bf16.msra.mxu1 %v290_v8 }
 0x113   :  { %v124_v10 = vpop.f32.mrb[0].mxu0 }
 0x114   :  { %v125_v11 = vadd.f32 %v238_v9, %v124_v10  ;;  %v263_v12 = vpop.f32.mrb[1].mxu0 }
 0x115   :  { %v127_v13 = vpop.f32.mrb[2].mxu0 }
 0x116   :  { %291 = vtanh.f32 %v125_v11  ;;  %v264_v14 = vpop.f32.mrb[3].mxu0 }
 0x120   :  { %v292_v15 = vpop.eup %291 }
 0x121   :  { %v131_v16 = vpack.c.bf16 %v292_v15, %v292_v15 }
 0x123   :  { %274 = vmatmul.mubr.msk.bf16.vlgmr.msra.gmra.mrb[0].mxu1 %vm171_vm2, %v131_v16 }
 0x1f6   :  { %v209_v18 = vpop.f32.mrb[0].mxu1 }
 0x1f7   :  { %v210_v19 = vadd.f32 %v242_v17, %v209_v18  ;;  %v275_v20 = vpop.f32.mrb[1].mxu1 }
 0x1f8   :  { %v212_v21 = vpop.f32.mrb[2].mxu1 }
 0x1f9   :  { %v248_v22 = vmul.f32 -1.442695, %v210_v19  ;;  %v276_v23 = vpop.f32.mrb[3].mxu1 }
 0x1fb   :  { %293 = vpow2.f32 %v248_v22 }
 0x205   :  { %v294_v24 = vpop.eup %293 }
 0x206   :  { %v218_v25 = vadd.f32 1.0, %v294_v24 }
 0x208   :  { %295 = vrcp.f32 %v218_v25 }
 0x212   :  { %v296_v26 = vpop.eup %295 }
 0x213   :  { %221 = vst [vmem:[#allocation8] sm:$0xff] %v296_v26 }
 0x214   :  { %374 = shalt.err (!%p371_p0)
}
 0x215   :  { %s375_s10 = scalar_lea.hbm %s494_s5, 128 }
 0x216   :  { %p376_p1 = scmp.ne.s32.totalorder %s494_s5, %s375_s10  ;;  %p379_p2 = scmp.lt.u32.totalorder %s375_s10, %s494_s5 }
 0x218   :  { %p381_p3 = pnand %p379_p2, %p376_p1 }
 0x21a   :  { %384 = shalt.err (!%p381_p3)
}
 0x21b   :  { %231 = dma.vmem_to_hbm [thread:$0]  %s229_s7, 128, %s494_s5, [#allocation4]  }
 0x21c   :  { %389 = dma.done.wait [#allocation4], 128  }
 0x21d   :  { %390 = vsyncadd [#allocation4], 4294967168 }
 0x21e   :  { %235 = vsyncpa [#allocation3], 1 }
 0x21f   :  { %236 = vsyncpa [#allocation6], 1 }
 0x220   :  { %237 = vsyncpa [#allocation4], 1 }

</bundles_post_ra>
